<compile_context>
chip_gen: v6e
topology: v6e:2x2x1
jax: 0.10.0
libtpu: 0.0.40
codegen_flags: <defaults>
</compile_context>

<pallas_src>
import jax
import jax.numpy as jnp
from jax.experimental import pallas as pl
from jax.experimental.pallas import tpu as pltpu


# ----------------------------- Pallas kernel ------------------------------- #

def _repvgg1x1_fused_kernel(wT_ref, b_ref, x_ref, o_ref):
    """One tile: relu(W_eff^T @ x_tile + b_eff).

    wT_ref: (Cout, Cin)   compute dtype (bf16)
    b_ref : (Cout, 1)     f32
    x_ref : (1, Cin, TS)  compute dtype (bf16)
    o_ref : (1, Cout, TS) output dtype
    """
    x = x_ref[0]                                                  # (Cin, TS)
    acc = jnp.dot(wT_ref[...], x, preferred_element_type=jnp.float32)
    y = acc + b_ref[...]                                          # lane broadcast
    o_ref[0] = jnp.maximum(y, 0.0).astype(o_ref.dtype)


# --------------------------------- glue ------------------------------------ #

def _fuse_conv_bn(w_oi, gamma, beta, mean, var, eps=1e-5):
    """Fold conv (1x1, groups=1) + BN(eval) into (W_eff[Cin,Cout], b_eff[1,Cout])."""
    std = jnp.sqrt(var + eps)
    t = gamma / std                                    # (Cout,)
    w_eff = (w_oi * t[:, None]).T                      # (Cin, Cout)
    b_eff = (beta - mean * t)[None, :]                 # (1, Cout)
    return w_eff.astype(jnp.float32), b_eff.astype(jnp.float32)


def _fuse_bn_identity(gamma, beta, mean, var, eps=1e-5):
    std = jnp.sqrt(var + eps)
    t = gamma / std
    return (t[None, :]).astype(jnp.float32), ((beta - mean * t)[None, :]).astype(jnp.float32)


def _pick_spatial_tile(hw, cin, cout, out_itemsize, max_bytes=8 << 20):
    """Largest lane-dense (multiple of 128) tile dividing hw under a VMEM budget.

    Budget counts double-buffered x (bf16) + out + the (double-buffered) weight
    block; 8 MiB stays well inside v5e's 16 MiB scoped default and v7x's 64 MiB.
    """
    w_bytes = 2 * (cout * cin * 2 + cout * 4)
    for ts in (2048, 1024, 512, 256, 128):
        if hw % ts == 0:
            footprint = 2 * ts * (cin * 2 + cout * out_itemsize) + w_bytes
            if footprint <= max_bytes:
                return ts
    return hw  # fall back to a single full-spatial block (full-dim exception)


def repvgg_block_1x1_forward(x_nchw, params, *, stride=1,
                             compute_dtype=jnp.bfloat16, out_dtype=None):
    """Forward pass of RepVGGBlock1x1 (train-time topology, eval-mode BN)."""
    if stride != 1:
        # 1x1 conv, padding=0, stride s  ==  spatial subsampling.
        x_nchw = x_nchw[:, :, ::stride, ::stride]
    B, Cin, H, W = x_nchw.shape
    HW = H * W
    out_dtype = out_dtype or x_nchw.dtype

    # --- RepVGG re-parameterization: fold all branches into one affine matmul.
    w_eff = params["dense_w"] + params["one_w"]          # (Cin, Cout) f32
    b_eff = params["dense_b"] + params["one_b"]          # (1, Cout)   f32
    if params["id_scale"] is not None:                   # Cin == Cout here
        w_eff = w_eff + jnp.diag(params["id_scale"][0])
        b_eff = b_eff + params["id_shift"]
    Cout = w_eff.shape[1]

    wT = jnp.transpose(w_eff).astype(compute_dtype)      # (Cout, Cin) bf16
    b_col = jnp.reshape(b_eff, (Cout, 1)).astype(jnp.float32)

    # NCHW -> (B, Cin, HW): contiguous reshape, no transpose / HBM relayout.
    x3d = x_nchw.reshape(B, Cin, HW).astype(compute_dtype)

    ts = _pick_spatial_tile(HW, Cin, Cout, jnp.dtype(out_dtype).itemsize)
    grid = (B, HW // ts)

    # NOTE: weight/bias blocks are grid-invariant; double-buffering them costs
    # only a few KiB here, so we skip pipeline_mode=pl.Buffered(1) for safety.
    w_spec = pl.BlockSpec((Cout, Cin), lambda b, j: (0, 0))
    b_spec = pl.BlockSpec((Cout, 1), lambda b, j: (0, 0))
    x_spec = pl.BlockSpec((1, Cin, ts), lambda b, j: (b, 0, j))
    o_spec = pl.BlockSpec((1, Cout, ts), lambda b, j: (b, 0, j))

    y3d = pl.pallas_call(
        _repvgg1x1_fused_kernel,
        out_shape=jax.ShapeDtypeStruct((B, Cout, HW), out_dtype),
        grid_spec=pltpu.PrefetchScalarGridSpec(
            num_scalar_prefetch=0,
            grid=grid,
            in_specs=[w_spec, b_spec, x_spec],
            out_specs=o_spec,
        ),
        compiler_params=pltpu.CompilerParams(
            dimension_semantics=("parallel", "parallel")),
    )(wT, b_col, x3d)

    return y3d.reshape(B, Cout, H, W)


def make_params(key, in_channels, out_channels, stride=1, eps=1e-5):
    """Deterministic parameter init matching the torch module's shapes."""
    ks = jax.random.split(key, 12)
    # rbr_dense: Conv2d(Cin, Cout, 1, bias=False) weight (Cout, Cin) + BN(Cout)
    wd = jax.random.normal(ks[0], (out_channels, in_channels), jnp.float32) * 0.1
    gd = 1.0 + 0.1 * jax.random.normal(ks[1], (out_channels,), jnp.float32)
    bd = 0.1 * jax.random.normal(ks[2], (out_channels,), jnp.float32)
    md = 0.1 * jax.random.normal(ks[3], (out_channels,), jnp.float32)
    vd = jnp.abs(jax.random.normal(ks[4], (out_channels,), jnp.float32)) + 0.5
    # rbr_1x1: same shapes
    w1 = jax.random.normal(ks[5], (out_channels, in_channels), jnp.float32) * 0.1
    g1 = 1.0 + 0.1 * jax.random.normal(ks[6], (out_channels,), jnp.float32)
    b1 = 0.1 * jax.random.normal(ks[7], (out_channels,), jnp.float32)
    m1 = 0.1 * jax.random.normal(ks[8], (out_channels,), jnp.float32)
    v1 = jnp.abs(jax.random.normal(ks[9], (out_channels,), jnp.float32)) + 0.5

    dense_w, dense_b = _fuse_conv_bn(wd, gd, bd, md, vd, eps)
    one_w, one_b = _fuse_conv_bn(w1, g1, b1, m1, v1, eps)

    params = {"dense_w": dense_w, "dense_b": dense_b,
              "one_w": one_w, "one_b": one_b,
              "id_scale": None, "id_shift": None}

    if out_channels == in_channels and stride == 1:
        gi = 1.0 + 0.1 * jax.random.normal(ks[10], (in_channels,), jnp.float32)
        bi = 0.1 * jax.random.normal(ks[11], (in_channels,), jnp.float32)
        mi = 0.05 * jnp.arange(in_channels, dtype=jnp.float32)
        vi = 1.0 + 0.01 * jnp.arange(in_channels, dtype=jnp.float32)
        ids, idb = _fuse_bn_identity(gi, bi, mi, vi, eps)
        params["id_scale"], params["id_shift"] = ids, idb
    return params


def _reference(x_nchw, params, stride=1):
    """Pure-JAX f32 reference following the torch forward (branch-wise sum)."""
    if stride != 1:
        x_nchw = x_nchw[:, :, ::stride, ::stride]
    B, Cin, H, W = x_nchw.shape
    x2d = jnp.transpose(x_nchw, (0, 2, 3, 1)).reshape(-1, Cin)
    y = (x2d @ params["dense_w"] + params["dense_b"]
         + x2d @ params["one_w"] + params["one_b"])
    if params["id_scale"] is not None:
        y = y + x2d * params["id_scale"] + params["id_shift"]
    y = jnp.maximum(y, 0.0)
    Cout = params["dense_w"].shape[1]
    return jnp.transpose(y.reshape(B, H, W, Cout), (0, 3, 1, 2))


# TODO(synk): training-mode BatchNorm (batch statistics + running-stat updates)
# is not implemented; eval-mode running statistics are assumed (as in deploy /
# re-parameterized inference).

if __name__ == "__main__":
    key = jax.random.PRNGKey(0)
    kx, kp = jax.random.split(key)

    B, C, Hs, Ws = 2, 4, 16, 16       # Cin == Cout, stride 1 -> identity branch active
    x = jax.random.normal(kx, (B, C, Hs, Ws), jnp.float32)
    params = make_params(kp, in_channels=C, out_channels=C, stride=1)

    out = repvgg_block_1x1_forward(x, params, stride=1)
    out = jax.block_until_ready(out)

    ref = _reference(x, params, stride=1)
    assert out.shape == (B, C, Hs, Ws)
    # bf16 inputs/weights with f32 accumulation vs a pure-f32 reference:
    # tolerance sized for bf16 rounding of x / W_eff.
    assert jnp.allclose(out, ref, atol=5e-2, rtol=5e-2), "mismatch vs reference"
    print("KERNEL_OK")
</pallas_src>

<mosaic_0001>
module attributes {stable_mosaic.version = 11 : i64} {
  func.func @_repvgg1x1_fused_kernel(%arg0: i32, %arg1: i32, %arg2: memref<4x4xbf16, #tpu.memory_space<vmem>>, %arg3: memref<4x1xf32, #tpu.memory_space<vmem>>, %arg4: memref<1x4x256xbf16, #tpu.memory_space<vmem>>, %arg5: memref<1x4x256xf32, #tpu.memory_space<vmem>>) attributes {dimension_semantics = [#tpu.dimension_semantics<parallel>, #tpu.dimension_semantics<parallel>], iteration_bounds = array<i64: 2, 1>, scalar_prefetch = 0 : i64, scratch_operands = 0 : i64, tpu.core_type = #tpu.core_type<tc>, window_params = [{pipeline_mode = #tpu.pipeline_mode<synchronous>, transform_indices = @transform_0, window_bounds = array<i64: 4, 4>}, {pipeline_mode = #tpu.pipeline_mode<synchronous>, transform_indices = @transform_1, window_bounds = array<i64: 4, 1>}, {transform_indices = @transform_2, window_bounds = array<i64: 1, 4, 256>}, {transform_indices = @transform_3, window_bounds = array<i64: 1, 4, 256>}]} {
    %c0 = arith.constant 0 : index
    %c0_0 = arith.constant 0 : index
    %c0_1 = arith.constant 0 : index
    %0 = vector.load %arg4[%c0, %c0_0, %c0_1] : memref<1x4x256xbf16, #tpu.memory_space<vmem>>, vector<1x4x256xbf16>
    %1 = vector.shape_cast %0 : vector<1x4x256xbf16> to vector<4x256xbf16>
    %c0_2 = arith.constant 0 : index
    %c0_3 = arith.constant 0 : index
    %2 = vector.load %arg2[%c0_2, %c0_3] : memref<4x4xbf16, #tpu.memory_space<vmem>>, vector<4x4xbf16>
    %cst = arith.constant dense<0.000000e+00> : vector<4x256xf32>
    %3 = tpu.matmul %2, %1, %cst {dimension_numbers = #tpu.dot_dimension_numbers<[1], [0], [0], [1], [0, 0, 1, 1], [], []>} : vector<4x4xbf16>, vector<4x256xbf16>, vector<4x256xf32> -> vector<4x256xf32>
    %c0_4 = arith.constant 0 : index
    %c0_5 = arith.constant 0 : index
    %4 = vector.load %arg3[%c0_4, %c0_5] : memref<4x1xf32, #tpu.memory_space<vmem>>, vector<4x1xf32>
    %5 = vector.broadcast %4 : vector<4x1xf32> to vector<4x256xf32>
    %6 = arith.addf %3, %5 : vector<4x256xf32>
    %cst_6 = arith.constant 0.000000e+00 : f32
    %7 = vector.broadcast %cst_6 : f32 to vector<4x256xf32>
    %8 = arith.maximumf %6, %7 : vector<4x256xf32>
    %c0_7 = arith.constant 0 : index
    %c0_8 = arith.constant 0 : index
    %c0_9 = arith.constant 0 : index
    %9 = vector.load %arg5[%c0_7, %c0_8, %c0_9] : memref<1x4x256xf32, #tpu.memory_space<vmem>>, vector<1x4x256xf32>
    %10 = vector.shape_cast %9 : vector<1x4x256xf32> to vector<4x256xf32>
    %11 = vector.shape_cast %8 : vector<4x256xf32> to vector<1x4x256xf32>
    tpu.vector_store %arg5[%c0_7, %c0_8, %c0_9], %11 {strides = array<i32>} : memref<1x4x256xf32, #tpu.memory_space<vmem>>, vector<1x4x256xf32>,
    return
  }
  func.func @transform_0(%arg0: i32, %arg1: i32) -> (i32, i32) {
    %c0_i32 = arith.constant 0 : i32
    %c0_i32_0 = arith.constant 0 : i32
    %c0_i32_1 = arith.constant 0 : i32
    return %c0_i32, %c0_i32_0 : i32, i32
  }
  func.func @transform_1(%arg0: i32, %arg1: i32) -> (i32, i32) {
    %c0_i32 = arith.constant 0 : i32
    %c0_i32_0 = arith.constant 0 : i32
    %c0_i32_1 = arith.constant 0 : i32
    return %c0_i32, %c0_i32_0 : i32, i32
  }
  func.func @transform_2(%arg0: i32, %arg1: i32) -> (i32, i32, i32) {
    %c0_i32 = arith.constant 0 : i32
    %c0_i32_0 = arith.constant 0 : i32
    return %arg0, %c0_i32, %arg1 : i32, i32, i32
  }
  func.func @transform_3(%arg0: i32, %arg1: i32) -> (i32, i32, i32) {
    %c0_i32 = arith.constant 0 : i32
    %c0_i32_0 = arith.constant 0 : i32
    return %arg0, %c0_i32, %arg1 : i32, i32, i32
  }
}

</mosaic_0001>

<bundles_post_ra>
// kernel: tpu_custom_call.1
= control target key start
LH: loop header
LB: loop body
LE: loop exit
PB: predicated region body
PF: predicated region fallthrough
CT: control target
= control target key end

     0   :  { %8 = vsyncpa [#allocation3], 0  ;;  %s737_s0 = inlined_call_operand.hbm [shape: bf16[4,4], index: 0, kind: input, shape index: {}]   ;;  %s738_s1 = inlined_call_operand.vmem [shape: f32[4,1], index: 1, kind: input, shape index: {}]   ;;  %s739_s2 = inlined_call_operand.vmem [shape: bf16[2,4,256], index: 2, kind: input, shape index: {}]   ;;  %s740_s3 = inlined_call_operand.hbm [shape: f32[2,4,256], index: 3, kind: output, shape index: {}]  }
   0x1   :  { %9 = vsyncpa [#allocation4], 0 }
   0x2   :  { %11 = vsyncpa [#allocation4 + $0x1], 0  ;;  %s614_s12 = smov 0   ;;  %s616_s13 = smov 0  }
   0x3   :  { %s618_s14 = smov 0   ;;  %s620_s15 = smov 0  }
   0x4   :  { %s622_s16 = smov 0   ;;  %s624_s17 = smov 0  }
   0x5 LB: > { %s395_s18 = sadd.s32 4294967295, %s589_s17   ;;  %s396_s19 = sadd.s32 4294967294, %s589_s17   ;;  %s589_s17 = sphi %s624_s17, %s17_s17   ;;  %s585_s16 = sphi %s622_s16, %s749_s16   ;;  %s581_s15 = sphi %s620_s15, %s748_s15   ;;  %s577_s14 = sphi %s618_s14, %s747_s14   ;;  %s573_s13 = sphi %s616_s13, %s746_s13   ;;  %s569_s12 = sphi %s614_s12, %s745_s12  }
   0x6   : > { %s29_s20 = sadd.s32 1, %s585_s16  ;;  %s108_s21 = sadd.s32 1, %s577_s14 }
   0x7   : > { %p31_p0 = scmp.ge.s32.totalorder %s29_s20, 2  ;;  %p118_p1 = scmp.ne.s32.totalorder %s577_s14, %s573_s13 }
   0x8   : > { %p119_p2 = scmp.eq.s32.totalorder %s395_s18, 1  ;;  %p124_p3 = scmp.ne.s32.totalorder %s573_s13, %s569_s12 }
   0x9   : > { %s751_s20 = smov (%p31_p0, %s29_s20), 0  ;;  %p125_p5 = scmp.eq.s32.totalorder %s396_s19, 1 }
   0xa   : > { %p654_p4 = por %p119_p2, %p118_p1  ;;  %s103_s23 = ssub.s32 %s585_s16, %s751_s20 }
   0xb   : > { %p397_p6 = scmp.ge.s32.totalorder %s589_s17, 1  ;;  %p106_p7 = scmp.eq.s32.totalorder %s103_s23, 0 }
   0xc   : > { %p661_p8 = por %p125_p5, %p124_p3  ;;  %p132_p9 = scmp.lt.s32.totalorder %s589_s17, 3 }
   0xd   : > { %s667_s25 = scalar_select %p106_p7, %s577_s14, %s108_s21  }
   0xe   : > { %p669_p10 = pnand %p397_p6, %p132_p9  ;;  %p673_p11 = scmp.eq.s32.totalorder %s395_s18, 0 }
   0xf   : > { %s591_s28 = smov [#allocation2]  }
  0x10   : > { %p421_p12 = pneg %p669_p10  ;;  %s145_s29 = sshll.u32 %s591_s28, 4  ;;  %s146_s29 = int_to_ptr.vmem [resolvable:$true] %s145_s29 }
  0x11   : > { %s494_s30 = scalar_lea.vmem %s146_s29, 32  ;;  %p502_p5 = scmp.lt.s32.totalorder %s146_s29, %s146_s29 }
  0x12   : > { %p422_p13 = pnand %p673_p11, %p421_p12  ;;  %p495_p1 = scmp.ne.s32.totalorder %s146_s29, %s494_s30 }
  0x13   : > { %p503_p6 = scmp.lt.s32.totalorder %s494_s30, %s494_s30 }
  0x14   : > { %p485_p0 = pneg %p422_p13 }
  0x15   : > { %p504_p7 = por %p503_p6, %p502_p5 }
  0x16   : > { %p497_p2 = pnand %p495_p1, %p485_p0 }
  0x18   : > { %p498_p3 = pneg %p497_p2 }
  0x1a   : > { %p505_p9 = pnand %p504_p7, %p498_p3 }
  0x1c   : > { %508 = shalt.err (!%p505_p9)
}
  0x1d   : > { %424 = dma.hbm_to_vmem [thread:$0]  (!%p422_p13), %s737_s0, 32, %s146_s29, [#allocation3]  }
  0x1e   : > { %174 = sbr.rel (%p669_p10) target bundleno = 263 (0x107), region = 32 }
  0x23   : > { %560 = dma.done.wait (%p673_p11), [#allocation3], 32  }
  0x24   : > { %562 = vsyncadd (%p673_p11), [#allocation3], 4294967264  ;;  %p203_p12 = scmp.lt.s32.totalorder %s581_s15, 1  ;;  %v592_v0 = vmov 0   ;;  %vm235_vm0 = vcmask 1041408   ;;  %vm231_vm1 = vcmask 31744  }
  0x25   : > { %274 = vmatprep.mubr.bf16.mxu0 %v592_v0  ;;  %482 = vset.pattern.permute.xlu0 %v592_v0  ;;  %v216_v4 = vld [vmem:[%s738_s1] sm:$0xf]  ;;  %s199_s19 = sand.u32 1, %s573_s13   ;;  %s414_s23 = sshll.u32 %s581_s15, 7 }
  0x26   : > { %s204_s6 = scalar_select %p203_p12, %s581_s15, 1  ;;  %219 = vperm.xlu0 %482, %v216_v4   ;;  %v215_v5 = vld [vmem:[#allocation2] sm:$0x3] }
  0x27   : > { %s402_s21 = sshll.u32 %s199_s19, 3  ;;  %s305_s30 = scalar_lea.hbm %s740_s3, %s414_s23 }
  0x28   : > { %s413_s7 = sshll.u32 %s204_s6, 2  ;;  %s201_s26 = scalar_lea.vmem [#allocation5], %s402_s21 }
  0x29   : > { %s210_s10 = scalar_lea.vmem %s739_s2, %s413_s7  ;;  %s307_s27 = sshll.u32 %s201_s26, 4  ;;  %s308_s27 = int_to_ptr.vmem [resolvable:$true] %s307_s27 }
  0x2a   : > { %v405_v1 = vld.sshfl [vmem:[%s210_s10] sm:$0x33 pattern:$0x76325410]  ;;  %s291_s4 = scalar_lea.sflag [#allocation4], %s199_s19  ;;  %s509_s5 = scalar_lea.vmem %s308_s27, 128 }
  0x2b   : > { %v230_v2 = vcombine.high %v405_v1, %v405_v1  ;;  %v237_v3 = vsel %vm235_vm0, %v405_v1, 0  ;;  %p510_p10 = scmp.ne.s32.totalorder %s308_s27, %s509_s5  ;;  %s593_s6 = smov [#allocation5]  }
  0x2c   : > { %s513_s15 = sshll.u32 %s593_s6, 4  ;;  %s514_s15 = int_to_ptr.vmem [resolvable:$false] %s513_s15 }
  0x2d   : > { %406 = vmatprep.subr.msk.bf16.mxu0 %vm235_vm0, %v230_v2  ;;  %p511_p11 = pnand %p510_p10, %p654_p4  ;;  %s515_s7 = scalar_lea.vmem %s514_s15, 256 }
  0x2e   : > { %257 = vmatpush1.bf16.msra.mxu0 %v237_v3  ;;  %p516_p0 = scmp.lt.s32.totalorder %s308_s27, %s514_s15  ;;  %p517_p1 = scmp.lt.s32.totalorder %s515_s7, %s509_s5 }
  0x2f   : > { %p512_p13 = pneg %p511_p11 }
  0x30   : > { %p518_p2 = por %p517_p1, %p516_p0 }
  0x31   : > { %407 = vmatmul.mubr.msk.bf16.vlgmr.msra.gmra.mxu0 %vm231_vm1, %v215_v5 }
  0x32   : > { %p519_p3 = pnand %p518_p2, %p512_p13 }
  0xa1   : > { %v220_v6 = vpop.permute.xlu0 %219 }
  0xf1   : > { %v276_v7 = vpop.f32.mrf.mxu0 }
  0xf2   : > { %v277_v8 = vadd.f32 %v276_v7, %v220_v6 }
  0xf3   : > { %v278_v9 = vpop.f32.mrf.mxu0 }
  0xf4   : > { %v279_v10 = vadd.f32 %v278_v9, %v220_v6  ;;  %v283_v12 = vmax.f32 %v277_v8, 0.0 }
  0xf5   : > { %v280_v11 = vpop.f32.mrf.mxu0 }
  0xf6   : > { %v284_v13 = vmax.f32 %v279_v10, 0.0 }
  0xf7   : > { %v281_v14 = vpop.f32.mrf.mxu0 }
  0xf8   : > { %v287_v15 = vcombine.low %v283_v12, %v284_v13 }
  0xfa   : > { %289 = vst [vmem:[%s201_s26] sm:$0xff] %v287_v15 }
  0xfb   : > { %522 = shalt.err (!%p519_p3)
}
  0xfc   : > { %s523_s8 = scalar_lea.hbm %s305_s30, 128  ;;  %s527_s11 = scalar_lea.hbm %s740_s3, 256 }
  0xfd   : > { %p524_p5 = scmp.ne.s32.totalorder %s305_s30, %s523_s8  ;;  %p528_p9 = scmp.lt.s32.totalorder %s305_s30, %s740_s3 }
  0xfe   : > { %p529_p12 = scmp.lt.s32.totalorder %s527_s11, %s523_s8 }
  0xff   : > { %p525_p6 = pnand %p524_p5, %p654_p4 }
 0x100   : > { %p530_p10 = por %p529_p12, %p528_p9 }
 0x101   : > { %p526_p7 = pneg %p525_p6 }
 0x103   : > { %p531_p11 = pnand %p530_p10, %p526_p7 }
 0x105   : > { %534 = shalt.err (!%p531_p11)
}
 0x106   : > { %419 = dma.vmem_to_hbm [thread:$0]  (%p654_p4), %s308_s27, 128, %s305_s30, %s291_s4  }
 0x107 PF: > { %p431_p13 = scmp.ge.s32.totalorder %s589_s17, 2  ;;  %s319_s21 = sand.u32 1, %s569_s12  }
 0x108   : > { %s320_s23 = scalar_lea.sflag [#allocation4], %s319_s21 }
 0x109   : > { %p426_p0 = pnand %p431_p13, %p661_p8 }
 0x10b   : > { %p427_p1 = pneg %p426_p0 }
 0x10d   : > { %564 = dma.done.wait (%p427_p1), %s320_s23, 128  }
 0x10e   : > { %566 = vsyncadd (%p427_p1), %s320_s23, 4294967168  ;;  %s17_s17 = sadd.s32 1, %s589_s17   ;;  %s745_s12 = smov %s573_s13 }
 0x10f   : > { %p14_p2 = scmp.ge.s32.totalorder %s17_s17, 4   ;;  %s746_s13 = smov %s577_s14 }
 0x110   : > { %s747_s14 = smov %s667_s25  ;;  %s748_s15 = smov %s585_s16 }
 0x111   : > { %s749_s16 = smov %s751_s20  ;;  %16 = sbr.rel (!%p14_p2) target bundleno = 5 (0x5), region = 72 }
 0x116   :  { %325 = vsyncpa [#allocation3], 1 }
 0x117   :  { %327 = vsyncpa [#allocation3 + $0x1], 1 }
 0x118   :  { %328 = vsyncpa [#allocation4], 1 }
 0x119   :  { %330 = vsyncpa [#allocation4 + $0x1], 1 }

</bundles_post_ra>
